<compile_context>
chip_gen: v7x
topology: tpu7x:2x2x1
jax: 0.10.0
libtpu: 0.0.40
codegen_flags: <defaults>
</compile_context>

<pallas_src>
import functools

import jax
import jax.numpy as jnp
from jax.experimental import pallas as pl
from jax.experimental.pallas import tpu as pltpu


_LANE = 128
_FALLBACK_VMEM_CAPACITY = 64 * 1024 * 1024   # v7x per-TC physical VMEM (smallest)


def _round_up(x, m):
    return (x + m - 1) // m * m


def _ceil_div(a, b):
    return -(-a // b)


def _sublane_multiple(itemsize):
    # Native packed sublane tile: (8,128) f32/i32, (16,128) bf16, (32,128) i8/fp8.
    return {4: 8, 2: 16, 1: 32}.get(int(itemsize), 8)


def _vmem_capacity_bytes():
    try:
        cap = int(getattr(pltpu.get_tpu_info(), "vmem_capacity_bytes", 0))
        if cap > 0:
            return cap
    except Exception:
        pass
    return _FALLBACK_VMEM_CAPACITY


def _vmem_limit_bytes(capacity):
    # v7x (64 MiB physical) -> 48 MiB; v5e/v6e (128 MiB) -> 96 MiB.
    return max(32 * 1024 * 1024, min(capacity * 3 // 4, 96 * 1024 * 1024))


def _pick_tile_n(n_rows, n_classes, in_itemsize, sublane, vmem_limit, reduction):
    """Largest row tile whose true (lane-padded) VMEM footprint fits the budget."""
    c_pad = _round_up(max(n_classes, 1), _LANE)
    # Bytes of VMEM per tile row:
    #   * logits input block, double buffered, lane padded to c_pad
    #   * targets (tile_n, 1) int32 block, lane padded to 128, double buffered
    #   * f32 in-kernel working set over (tile_n, c_pad): cast, exp(x-m),
    #     iota/compare, one-hot select (~4 live temporaries)
    #   * reduction='none' output (tile_n, 1) f32, lane padded, double buffered
    per_row = 2 * (c_pad * in_itemsize + _LANE * 4) + 4 * c_pad * 4
    if reduction == "none":
        per_row += 2 * _LANE * 4
    budget = int(vmem_limit * 0.7)       # headroom: outputs, sems, compiler scratch
    t = max(budget // per_row, sublane)  # TODO(synk): class-split grid for huge C
    # Keep >= 4 grid steps when N allows so v7x's two TensorCores both get work.
    t = min(t, _round_up(_ceil_div(n_rows, 4), sublane), _round_up(n_rows, sublane))
    t = max(sublane, t // sublane * sublane)
    return t


def _focal_rows(x_raw, t, *, alpha, gamma, ignore_index):
    """Per-row focal loss for one (TN, C) tile -> (focal (TN,1), valid (TN,1))."""
    x = x_raw.astype(jnp.float32)                       # (TN, C)
    valid = t != ignore_index                           # (TN, 1) bool

    # Numerically stable logsumexp along the class (lane) axis.
    m = jnp.max(x, axis=-1, keepdims=True)
    lse = jnp.log(jnp.sum(jnp.exp(x - m), axis=-1, keepdims=True)) + m

    # One-hot gather of the target logit (no lane-dynamic gather on TPU).
    # NOTE: targets outside [0, C) (other than ignore_index) silently give
    # x_t = 0 instead of an error (torch.gather would raise) — inputs trusted.
    class_ids = jax.lax.broadcasted_iota(jnp.int32, x.shape, 1)
    safe_t = jnp.where(valid, t, 0)
    x_t = jnp.sum(jnp.where(class_ids == safe_t, x, 0.0), axis=-1, keepdims=True)

    log_pt = x_t - lse                                   # (TN, 1)
    pt = jnp.exp(log_pt)
    ce = -log_pt

    # focal term (1 - pt)^gamma ; integer gamma unrolled to plain multiplies.
    base = 1.0 - pt
    g = float(gamma)
    if g == int(g) and g >= 0:
        focal_term = jnp.ones_like(pt)
        for _ in range(int(g)):
            focal_term = focal_term * base
    else:
        focal_term = jnp.power(jnp.maximum(base, 0.0), g)

    focal = alpha * focal_term * ce
    # IMPORTANT: the per-element mask must be applied BEFORE any summation —
    # a partial last logits tile contains garbage rows whose NaN/Inf results
    # are only removed by this select (padded targets carry ignore_index).
    focal = jnp.where(valid, focal, 0.0)
    return focal, valid


def _focal_sum_kernel(logits_ref, targets_ref, sum_ref, cnt_ref,
                      *, alpha, gamma, ignore_index):
    focal, valid = _focal_rows(logits_ref[...], targets_ref[...],
                               alpha=alpha, gamma=gamma,
                               ignore_index=ignore_index)
    sum_ref[...] = jnp.sum(focal, keepdims=True).reshape(1, 1, 1)
    cnt_ref[...] = jnp.sum(valid.astype(jnp.float32), keepdims=True).reshape(1, 1, 1)


def _focal_none_kernel(logits_ref, targets_ref, per_ref,
                       *, alpha, gamma, ignore_index):
    focal, _ = _focal_rows(logits_ref[...], targets_ref[...],
                           alpha=alpha, gamma=gamma, ignore_index=ignore_index)
    per_ref[...] = focal.astype(per_ref.dtype)


def focal_loss(logits, targets, *, alpha=1.0, gamma=2.0, reduction="mean",
               ignore_index=-100, tile_n=None):
    """Pallas-backed FocalLoss forward. logits: (N, C) float, targets: (N,) int."""
    logits = jnp.asarray(logits)
    targets = jnp.asarray(targets).reshape(-1)
    assert logits.ndim == 2, "kernel implements the (N, C) / (N,) case"
    N, C = logits.shape

    if reduction not in ("mean", "sum", "none"):
        raise ValueError(f"Unsupported reduction type: {reduction}")

    if N == 0 or C == 0:
        if reduction in ("mean", "sum"):
            return jnp.asarray(0.0, dtype=logits.dtype)
        return jnp.zeros((0,), dtype=logits.dtype)

    itemsize = jnp.dtype(logits.dtype).itemsize
    sublane = _sublane_multiple(itemsize)
    vmem_limit = _vmem_limit_bytes(_vmem_capacity_bytes())

    if tile_n is None:
        tile_n = _pick_tile_n(N, C, itemsize, sublane, vmem_limit, reduction)
    tile_n = max(sublane, int(tile_n) // sublane * sublane)
    num_tiles = _ceil_div(N, tile_n)
    Np = num_tiles * tile_n

    # Only targets get (tiny) host-side padding; logits stay unpadded. Padded
    # rows carry ignore_index, which also masks garbage rows of a partial
    # last logits tile. Targets are kept (tile_n, 1): making them lane-dense
    # would need an in-kernel lane->sublane relayout; their lane-padded VMEM
    # buffer is instead charged to the budget in _pick_tile_n.
    targets_p = jnp.full((Np, 1), ignore_index, dtype=jnp.int32)
    targets_p = targets_p.at[:N, 0].set(targets.astype(jnp.int32))

    kern_kwargs = dict(alpha=float(alpha), gamma=float(gamma),
                       ignore_index=int(ignore_index))
    in_specs = [
        pl.BlockSpec((tile_n, C), lambda i: (i, 0)),   # full class extent
        pl.BlockSpec((tile_n, 1), lambda i: (i, 0)),
    ]
    compiler_params = pltpu.CompilerParams(
        dimension_semantics=("parallel",),
        vmem_limit_bytes=int(vmem_limit),
    )
    out_bytes = (Np * 4) if reduction == "none" else (num_tiles * 8)
    cost = pl.CostEstimate(
        flops=int(8 * N * C),
        transcendentals=int(N * (C + 2)),
        bytes_accessed=int(N * C * itemsize + Np * 4 + out_bytes),
    )

    if reduction in ("mean", "sum"):
        sums, cnts = pl.pallas_call(
            functools.partial(_focal_sum_kernel, **kern_kwargs),
            out_shape=(
                jax.ShapeDtypeStruct((num_tiles, 1, 1), jnp.float32),  # per-tile sum
                jax.ShapeDtypeStruct((num_tiles, 1, 1), jnp.float32),  # per-tile count
            ),
            grid_spec=pltpu.PrefetchScalarGridSpec(
                num_scalar_prefetch=0,
                grid=(num_tiles,),
                in_specs=in_specs,
                out_specs=[
                    pl.BlockSpec((1, 1, 1), lambda i: (i, 0, 0)),
                    pl.BlockSpec((1, 1, 1), lambda i: (i, 0, 0)),
                ],
            ),
            compiler_params=compiler_params,
            cost_estimate=cost,
        )(logits, targets_p)
        total = jnp.sum(sums)
        if reduction == "sum":
            return total.astype(logits.dtype)
        count = jnp.sum(cnts)
        return (total / jnp.maximum(count, 1.0)).astype(logits.dtype)

    # reduction == "none": per-row losses only.
    # TODO(synk): lane-dense (1, tile_n) output blocks would avoid masked
    # stores here but require a (tile_n,1)->(1,tile_n) in-kernel relayout.
    per = pl.pallas_call(
        functools.partial(_focal_none_kernel, **kern_kwargs),
        out_shape=jax.ShapeDtypeStruct((Np, 1), jnp.float32),
        grid_spec=pltpu.PrefetchScalarGridSpec(
            num_scalar_prefetch=0,
            grid=(num_tiles,),
            in_specs=in_specs,
            out_specs=pl.BlockSpec((tile_n, 1), lambda i: (i, 0)),
        ),
        compiler_params=compiler_params,
        cost_estimate=cost,
    )(logits, targets_p)
    return per[:N, 0].astype(logits.dtype)


def _ref_focal(logits_f32, targets, *, alpha=1.0, gamma=2.0, ignore_index=-100):
    """Pure-JAX reference (same semantics as the PyTorch module for (N, C))."""
    logp = jax.nn.log_softmax(logits_f32, axis=-1)
    valid = targets != ignore_index
    safe = jnp.where(valid, targets, 0)
    log_pt = jnp.take_along_axis(logp, safe[:, None], axis=-1)[:, 0]
    ce = -log_pt
    fl = alpha * (1.0 - jnp.exp(log_pt)) ** gamma * ce
    fl = jnp.where(valid, fl, 0.0)
    return fl, valid


if __name__ == "__main__":
    key = jax.random.PRNGKey(0)
    k1, k2 = jax.random.split(key)

    # Small shapes consistent with the module: N=16 examples, C=8 classes.
    N, C = 16, 8
    logits = jax.random.normal(k1, (N, C), dtype=jnp.float32)
    targets = jax.random.randint(k2, (N,), 0, C, dtype=jnp.int32)
    targets = targets.at[3].set(-100).at[11].set(-100)  # exercise ignore_index

    loss = focal_loss(logits, targets, alpha=1.0, gamma=2.0,
                      reduction="mean", ignore_index=-100)
    loss = jax.block_until_ready(loss)

    fl, valid = _ref_focal(logits, targets)
    ref_mean = jnp.sum(fl) / jnp.maximum(jnp.sum(valid), 1)
    assert jnp.allclose(loss, ref_mean, atol=1e-5, rtol=1e-5), (loss, ref_mean)

    loss_sum = jax.block_until_ready(focal_loss(logits, targets, reduction="sum"))
    assert jnp.allclose(loss_sum, jnp.sum(fl), atol=1e-5, rtol=1e-5), loss_sum

    loss_none = jax.block_until_ready(focal_loss(logits, targets, reduction="none"))
    assert jnp.allclose(loss_none, fl, atol=1e-5, rtol=1e-5), loss_none

    # Partial-last-tile path (N not a multiple of tile_n) with unpadded logits:
    # garbage rows must be masked via the padded targets.
    N2 = 13
    logits2 = jax.random.normal(k1, (N2, C), dtype=jnp.float32)
    targets2 = jax.random.randint(k2, (N2,), 0, C, dtype=jnp.int32).at[5].set(-100)
    loss2 = jax.block_until_ready(
        focal_loss(logits2, targets2, reduction="mean", tile_n=8))
    fl2, valid2 = _ref_focal(logits2, targets2)
    ref2 = jnp.sum(fl2) / jnp.maximum(jnp.sum(valid2), 1)
    assert jnp.allclose(loss2, ref2, atol=1e-5, rtol=1e-5), (loss2, ref2)

    # bf16 input path: exercises the dtype-native sublane multiple (16) and the
    # in-kernel f32 cast; the result is cast back to bf16, so compare loosely.
    N3 = 64
    logits3 = jax.random.normal(k1, (N3, C), dtype=jnp.bfloat16)
    targets3 = jax.random.randint(k2, (N3,), 0, C, dtype=jnp.int32).at[7].set(-100)
    loss3 = jax.block_until_ready(
        focal_loss(logits3, targets3, reduction="mean"))
    fl3, valid3 = _ref_focal(logits3.astype(jnp.float32), targets3)
    ref3 = jnp.sum(fl3) / jnp.maximum(jnp.sum(valid3), 1)
    assert jnp.allclose(jnp.float32(loss3), ref3, atol=2e-2, rtol=2e-2), (loss3, ref3)

    print("KERNEL_OK")
</pallas_src>

<mosaic_0001>
module attributes {stable_mosaic.version = 11 : i64} {
  func.func @_focal_sum_kernel(%arg0: i32, %arg1: memref<8x8xf32, #tpu.memory_space<vmem>>, %arg2: memref<8x1xi32, #tpu.memory_space<vmem>>, %arg3: memref<1x1x1xf32, #tpu.memory_space<vmem>>, %arg4: memref<1x1x1xf32, #tpu.memory_space<vmem>>) attributes {dimension_semantics = [#tpu.dimension_semantics<parallel>], iteration_bounds = array<i64: 2>, scalar_prefetch = 0 : i64, scratch_operands = 0 : i64, tpu.core_type = #tpu.core_type<tc>, window_params = [{transform_indices = @transform_0, window_bounds = array<i64: 8, 8>}, {transform_indices = @transform_1, window_bounds = array<i64: 8, 1>}, {transform_indices = @transform_2, window_bounds = array<i64: 1, 1, 1>}, {transform_indices = @transform_3, window_bounds = array<i64: 1, 1, 1>}]} {
    %c0 = arith.constant 0 : index
    %c0_0 = arith.constant 0 : index
    %0 = vector.load %arg1[%c0, %c0_0] : memref<8x8xf32, #tpu.memory_space<vmem>>, vector<8x8xf32>
    %c0_1 = arith.constant 0 : index
    %c0_2 = arith.constant 0 : index
    %1 = vector.load %arg2[%c0_1, %c0_2] : memref<8x1xi32, #tpu.memory_space<vmem>>, vector<8x1xi32>
    %c-100_i32 = arith.constant -100 : i32
    %2 = vector.broadcast %c-100_i32 : i32 to vector<8x1xi32>
    %3 = arith.cmpi ne, %1, %2 : vector<8x1xi32>
    %cst = arith.constant dense<0xFF800000> : vector<8xf32>
    %4 = vector.multi_reduction <maximumf>, %0, %cst [1] : vector<8x8xf32> to vector<8xf32>
    %5 = vector.shape_cast %4 : vector<8xf32> to vector<8x1xf32>
    %6 = vector.broadcast %5 : vector<8x1xf32> to vector<8x8xf32>
    %7 = arith.subf %0, %6 : vector<8x8xf32>
    %8 = math.exp %7 : vector<8x8xf32>
    %cst_3 = arith.constant dense<0.000000e+00> : vector<8xf32>
    %9 = vector.multi_reduction <add>, %8, %cst_3 [1] : vector<8x8xf32> to vector<8xf32>
    %10 = vector.shape_cast %9 : vector<8xf32> to vector<8x1xf32>
    %11 = math.log %10 : vector<8x1xf32>
    %12 = arith.addf %11, %5 : vector<8x1xf32>
    %13 = tpu.iota {dimensions = array<i32: 1>} : vector<8x8xi32>
    %c0_i32 = arith.constant 0 : i32
    %14 = vector.broadcast %c0_i32 : i32 to vector<8x1xi32>
    %15 = arith.select %3, %1, %14 : vector<8x1xi1>, vector<8x1xi32>
    %16 = vector.broadcast %15 : vector<8x1xi32> to vector<8x8xi32>
    %17 = arith.cmpi eq, %13, %16 : vector<8x8xi32>
    %cst_4 = arith.constant 0.000000e+00 : f32
    %18 = vector.broadcast %cst_4 : f32 to vector<8x8xf32>
    %19 = arith.select %17, %0, %18 : vector<8x8xi1>, vector<8x8xf32>
    %cst_5 = arith.constant dense<0.000000e+00> : vector<8xf32>
    %20 = vector.multi_reduction <add>, %19, %cst_5 [1] : vector<8x8xf32> to vector<8xf32>
    %21 = vector.shape_cast %20 : vector<8xf32> to vector<8x1xf32>
    %22 = arith.subf %21, %12 : vector<8x1xf32>
    %23 = math.exp %22 : vector<8x1xf32>
    %cst_6 = arith.constant 0.000000e+00 : f32
    %24 = vector.broadcast %cst_6 : f32 to vector<8x1xf32>
    %25 = arith.subf %24, %22 : vector<8x1xf32>
    %cst_7 = arith.constant 1.000000e+00 : f32
    %26 = vector.broadcast %cst_7 : f32 to vector<8x1xf32>
    %27 = arith.subf %26, %23 : vector<8x1xf32>
    %cst_8 = arith.constant 1.000000e+00 : f32
    %28 = vector.broadcast %cst_8 : f32 to vector<8x1xf32>
    %29 = arith.mulf %28, %27 : vector<8x1xf32>
    %30 = arith.mulf %29, %27 : vector<8x1xf32>
    %cst_9 = arith.constant 1.000000e+00 : f32
    %31 = vector.broadcast %cst_9 : f32 to vector<8x1xf32>
    %32 = arith.mulf %31, %30 : vector<8x1xf32>
    %33 = arith.mulf %32, %25 : vector<8x1xf32>
    %cst_10 = arith.constant 0.000000e+00 : f32
    %34 = vector.broadcast %cst_10 : f32 to vector<8x1xf32>
    %35 = arith.select %3, %33, %34 : vector<8x1xi1>, vector<8x1xf32>
    %36 = vector.shape_cast %35 : vector<8x1xf32> to vector<1x8x1xf32>
    %cst_11 = arith.constant dense<0.000000e+00> : vector<1xf32>
    %37 = vector.multi_reduction <add>, %36, %cst_11 [1, 2] : vector<1x8x1xf32> to vector<1xf32>
    %38 = vector.shape_cast %37 : vector<1xf32> to vector<1x1x1xf32>
    %39 = vector.extract %38[0, 0, 0] : f32 from vector<1x1x1xf32>
    %40 = vector.broadcast %39 : f32 to vector<1x1xf32>
    %41 = vector.shape_cast %40 : vector<1x1xf32> to vector<1x1x1xf32>
    %c0_12 = arith.constant 0 : index
    %c0_13 = arith.constant 0 : index
    %c0_14 = arith.constant 0 : index
    %42 = vector.load %arg3[%c0_12, %c0_13, %c0_14] : memref<1x1x1xf32, #tpu.memory_space<vmem>>, vector<1x1x1xf32>
    tpu.vector_store %arg3[%c0_12, %c0_13, %c0_14], %41 {strides = array<i32>} : memref<1x1x1xf32, #tpu.memory_space<vmem>>, vector<1x1x1xf32>,
    %43 = arith.extui %3 : vector<8x1xi1> to vector<8x1xi32>
    %44 = arith.sitofp %43 : vector<8x1xi32> to vector<8x1xf32>
    %45 = vector.shape_cast %44 : vector<8x1xf32> to vector<1x8x1xf32>
    %cst_15 = arith.constant dense<0.000000e+00> : vector<1xf32>
    %46 = vector.multi_reduction <add>, %45, %cst_15 [1, 2] : vector<1x8x1xf32> to vector<1xf32>
    %47 = vector.shape_cast %46 : vector<1xf32> to vector<1x1x1xf32>
    %48 = vector.extract %47[0, 0, 0] : f32 from vector<1x1x1xf32>
    %49 = vector.broadcast %48 : f32 to vector<1x1xf32>
    %50 = vector.shape_cast %49 : vector<1x1xf32> to vector<1x1x1xf32>
    %c0_16 = arith.constant 0 : index
    %c0_17 = arith.constant 0 : index
    %c0_18 = arith.constant 0 : index
    %51 = vector.load %arg4[%c0_16, %c0_17, %c0_18] : memref<1x1x1xf32, #tpu.memory_space<vmem>>, vector<1x1x1xf32>
    tpu.vector_store %arg4[%c0_16, %c0_17, %c0_18], %50 {strides = array<i32>} : memref<1x1x1xf32, #tpu.memory_space<vmem>>, vector<1x1x1xf32>,
    return
  }
  func.func @transform_0(%arg0: i32) -> (i32, i32) {
    %c0_i32 = arith.constant 0 : i32
    %c0_i32_0 = arith.constant 0 : i32
    return %arg0, %c0_i32 : i32, i32
  }
  func.func @transform_1(%arg0: i32) -> (i32, i32) {
    %c0_i32 = arith.constant 0 : i32
    %c0_i32_0 = arith.constant 0 : i32
    return %arg0, %c0_i32 : i32, i32
  }
  func.func @transform_2(%arg0: i32) -> (i32, i32, i32) {
    %c0_i32 = arith.constant 0 : i32
    %c0_i32_0 = arith.constant 0 : i32
    %c0_i32_1 = arith.constant 0 : i32
    return %arg0, %c0_i32, %c0_i32_0 : i32, i32, i32
  }
  func.func @transform_3(%arg0: i32) -> (i32, i32, i32) {
    %c0_i32 = arith.constant 0 : i32
    %c0_i32_0 = arith.constant 0 : i32
    %c0_i32_1 = arith.constant 0 : i32
    return %arg0, %c0_i32, %c0_i32_0 : i32, i32, i32
  }
}

</mosaic_0001>

<bundles_post_ra>
// kernel: tpu_custom_call.1
= control target key start
LH: loop header
LB: loop body
LE: loop exit
PB: predicated region body
PF: predicated region fallthrough
CT: control target
= control target key end

     0   :  { %s398_s12 = smov 0   ;;  %s432_s0 = inlined_call_operand.vmem [shape: f32[16,8], index: 0, kind: input, shape index: {}]   ;;  %s433_s1 = inlined_call_operand.vmem [shape: s32[16,1], index: 1, kind: input, shape index: {}]   ;;  %s434_s2 = inlined_call_operand.vmem [shape: f32[2,1,1], index: 2, kind: output, shape index: {0}]   ;;  %s435_s3 = inlined_call_operand.vmem [shape: f32[2,1,1], index: 3, kind: output, shape index: {1}]  }
   0x1 LB: > { %s337_s13 = sadd.s32 4294967295, %s374_s12   ;;  %p341_p0 = scmp.ge.s32.totalorder %s374_s12, 1  ;;  %s374_s12 = sphi %s398_s12, %s14_s12  }
   0x2   : > { %p148_p1 = scmp.lt.s32.totalorder %s374_s12, 3 }
   0x4   : > { %p149_p2 = pnand %p341_p0, %p148_p1 }
   0x5   : > { %p176_p3 = scmp.lt.s32.totalorder (!%p149_p2), %s337_s13, 1  ;;  %v376_v0 = vmov (!%p149_p2), 0   ;;  %vm193_vm0 = vcmask (!%p149_p2), 64512   ;;  %v206_v8 = vlaneseq (!%p149_p2)  ;;  %vm225_vm3 = vcmask (!%p149_p2), 7168  }
   0x6   : > { %152 = sbr.rel (%p149_p2) target bundleno = 566 (0x236), region = 28  ;;  %361 = vset.pattern.permute.xlu0 (!%p149_p2), %v376_v0  ;;  %v377_v28 = vmov (!%p149_p2), 0.0   ;;  %vm237_vm4 = vcmask (!%p149_p2), 0  }
   0x7   : > { %v207_v9 = vand.u32 (!%p149_p2), 127, %v206_v8 }
   0xd   : > { %s437_s13 = smov (!%p176_p3, %s337_s13), 1 }
   0xe   : > { %s342_s14 = sshll.u32 %s437_s13, 3  ;;  %s186_s23 = scalar_lea.vmem %s434_s2, %s437_s13 }
   0xf   : > { %s179_s17 = scalar_lea.vmem %s432_s0, %s342_s14  ;;  %s183_s20 = scalar_lea.vmem %s433_s1, %s342_s14 }
  0x10   : > { %v190_v1 = vld [vmem:[%s179_s17] sm:$0xff]  ;;  %s189_s27 = scalar_lea.vmem %s435_s3, %s437_s13 }
  0x11   : > { %v194_v2 = vsel %vm193_vm0, %v190_v1, -inf  ;;  %v191_v3 = vld [vmem:[%s183_s20] sm:$0xff] }
  0x12   : > { %195 = vmax.xlane.f32.xlu0 %v194_v2  ;;  %vm192_vm1 = vcmp.ne.s32.totalorder %v191_v3, 4294967196 }
  0x13   : > { %v208_v4 = vsel %vm192_vm1, %v191_v3, 0  ;;  %v344_v29 = vsel %vm192_vm1, 1.0, %v377_v28 }
  0x14   : > { %v241_v31 = vsel %vm225_vm3, %v344_v29, 0.0 }
  0x28   : > { %210 = vperm.xlu0 %361, %v208_v4  }
  0x9f   : > { %v196_v5 = vpop.xlane.xlu0 %195 }
  0xa0   : > { %v197_v6 = vsub.f32 %v190_v1, %v196_v5 }
  0xa2   : > { %v198_v7 = vmul.f32 1.442695, %v197_v6 }
  0xa4   : > { %362 = vpow2.f32 %v198_v7 }
  0xa7   : > { %v211_v10 = vpop.permute.xlu0 %210 }
  0xa8   : > { %vm212_vm2 = vcmp.eq.s32.totalorder %v207_v9, %v211_v10 }
  0xa9   : > { %v213_v12 = vsel %vm212_vm2, %v190_v1, 0.0 }
  0xaa   : > { %v214_v14 = vsel %vm193_vm0, %v213_v12, 0.0 }
  0xae   : > { %v363_v11 = vpop.eup %362 }
  0xaf   : > { %v200_v13 = vsel %vm193_vm0, %v363_v11, 0.0 }
  0xb0   : > { %201 = vadd.xlane.f32.xlu1 %v200_v13 }
  0xb4   : > { %215 = vadd.xlane.f32.xlu1 %v214_v14 }
 0x13d   : > { %v202_v15 = vpop.xlane.xlu1 %201 }
 0x13e   : > { %364 = vlog2.f32 %v202_v15 }
 0x141   : > { %v216_v18 = vpop.xlane.xlu1 %215 }
 0x148   : > { %v365_v16 = vpop.eup %364 }
 0x149   : > { %v204_v17 = vmul.f32 0.6931472, %v365_v16 }
 0x14b   : > { %v205_v19 = vadd.f32 %v204_v17, %v196_v5 }
 0x14d   : > { %v217_v20 = vsub.f32 %v216_v18, %v205_v19 }
 0x14f   : > { %v218_v21 = vmul.f32 1.442695, %v217_v20  ;;  %v220_v24 = vsub.f32 0.0, %v217_v20 }
 0x151   : > { %366 = vpow2.f32 %v218_v21 }
 0x15b   : > { %v367_v22 = vpop.eup %366 }
 0x15c   : > { %v221_v23 = vsub.f32 1.0, %v367_v22 }
 0x15e   : > { %v222_v25 = vmul.f32 %v221_v23, %v221_v23 }
 0x160   : > { %v223_v26 = vmul.f32 %v222_v25, %v220_v24 }
 0x162   : > { %v224_v27 = vsel %vm192_vm1, %v223_v26, 0.0 }
 0x163   : > { %v226_v30 = vsel %vm225_vm3, %v224_v27, 0.0 }
 0x164   : > { %227 = vadd.xlane.f32.xlu1 %v226_v30 }
 0x168   : > { %242 = vadd.xlane.f32.xlu1 %v241_v31 }
 0x1f1   : > { %v228_v32 = vpop.xlane.xlu1 %227 }
 0x1f2   : > { %v229_v33 = vrot.slane %v228_v32, 4 }
 0x1f4   : > { %v230_v34 = vadd.f32 %v229_v33, %v228_v32 }
 0x1f5   : > { %v243_v35 = vpop.xlane.xlu1 %242 }
 0x1f6   : > { %v231_v36 = vrot.slane %v230_v34, 2  ;;  %v244_v37 = vrot.slane %v243_v35, 4 }
 0x1f8   : > { %v245_v38 = vadd.f32 %v244_v37, %v243_v35  ;;  %v232_v39 = vadd.f32 %v231_v36, %v230_v34 }
 0x1fa   : > { %v246_v40 = vrot.slane %v245_v38, 2  ;;  %v233_v41 = vrot.slane %v232_v39, 1 }
 0x1fc   : > { %v247_v42 = vadd.f32 %v246_v40, %v245_v38  ;;  %v234_v43 = vadd.f32 %v233_v41, %v232_v39 }
 0x1fe   : > { %347 = vpush %v234_v43  ;;  %v248_v44 = vrot.slane %v247_v42, 1 }
 0x200   : > { %v249_v45 = vadd.f32 %v248_v44, %v247_v42 }
 0x202   : > { %349 = vpush %v249_v45 }
 0x22f   : > { %s348_s24 = spop %347 }
 0x230   : > { %v236_v46 = vstv %s348_s24 }
 0x231   : > { %238 = vst.msk [vmem:[%s186_s23] sm:$0x1] %vm237_vm4, %v236_v46 }
 0x233   : > { %s350_s28 = spop %349 }
 0x234   : > { %v251_v47 = vstv %s350_s28 }
 0x235   : > { %252 = vst.msk [vmem:[%s189_s27] sm:$0x1] %vm237_vm4, %v251_v47 }
 0x236 PF: > { %s14_s12 = sadd.s32 1, %s374_s12  }
 0x237   : > { %p11_p4 = scmp.ge.s32.totalorder %s14_s12, 4  }
 0x239   :  { %13 = sbr.rel (!%p11_p4) target bundleno = 1 (0x1), region = 73 }

</bundles_post_ra>
